<compile_context>
chip_gen: v7x
topology: tpu7x:2x2x1
jax: 0.10.0
libtpu: 0.0.40
codegen_flags: <defaults>
</compile_context>

<pallas_src>
import math

import jax
import jax.numpy as jnp
from jax.experimental import pallas as pl
from jax.experimental.pallas import tpu as pltpu


def _pe2d_kernel(tab_h_ref, tab_w_ref, out_ref):
    """Write one (tc, th, W) output block.

    tab_h_ref : (tc, th, 1) f32  -- x-half table (zero for y channels)
    tab_w_ref : (tc, 1, W)  f32  -- y-half table (zero for x channels)
    out_ref   : (tc, th, W)      -- output block (batch dim squeezed by BlockSpec)
    """
    # Pure VPU broadcast-add + cast; the kernel is HBM-writeback bound by construction.
    out_ref[...] = (tab_h_ref[...] + tab_w_ref[...]).astype(out_ref.dtype)


def _pe2d_tables(C, H, W, channels):
    """Per-channel separable tables tab_h (C,H,1), tab_w (C,1,W), f32.

    For output channel c with F = channels // 2 and group = c // F:
      group 0 -> sin(h * inv_freq[j]),  group 1 -> cos(h * inv_freq[j])   (x half)
      group 2 -> sin(w * inv_freq[j]),  group 3 -> cos(w * inv_freq[j])   (y half)
    The table belonging to the *other* axis is exactly zero, so tab_h + tab_w equals
    the module's encoding value at every (c, h, w).
    """
    F = channels // 2
    inv_freq = 1.0 / (10000.0 ** (jnp.arange(0, channels, 2, dtype=jnp.float32)
                                  / float(channels)))                      # (F,)
    c = jnp.arange(C)
    group = c // F                       # 0: sin_x, 1: cos_x, 2: sin_y, 3: cos_y
    j = c - group * F
    freq_c = inv_freq[j]                                                   # (C,)
    is_cos = (group % 2) == 1
    is_x = group < 2

    arg_h = jnp.arange(H, dtype=jnp.float32)[None, :] * freq_c[:, None]    # (C, H)
    arg_w = jnp.arange(W, dtype=jnp.float32)[None, :] * freq_c[:, None]    # (C, W)
    tab_h = jnp.where(is_cos[:, None], jnp.cos(arg_h), jnp.sin(arg_h))
    tab_w = jnp.where(is_cos[:, None], jnp.cos(arg_w), jnp.sin(arg_w))
    tab_h = tab_h * is_x[:, None].astype(jnp.float32)
    tab_w = tab_w * jnp.logical_not(is_x)[:, None].astype(jnp.float32)
    return tab_h.reshape(C, H, 1), tab_w.reshape(C, 1, W)


def _largest_divisor(n, limit):
    for d in range(max(1, min(n, limit)), 0, -1):
        if n % d == 0:
            return d
    return 1


def _pick_h_tile(H, limit):
    """Largest divisor of H that is a multiple of 8 and <= limit, else full H."""
    if H <= limit:
        return H
    for d in range(max(1, min(H, limit)), 0, -1):
        if H % d == 0 and d % 8 == 0:
            return d
    # No sublane-aligned divisor fits the budget; a full-extent block is always legal.
    return H


def positional_encoding_2d(x, *, max_block_bytes=2 * 1024 * 1024):
    """Pallas implementation of PositionalEncoding2d.forward for NCHW input x."""
    B, C, H, W = x.shape
    channels = int(math.ceil(C / 4) * 2)      # module's self.channels (4*F >= C)

    tab_h, tab_w = _pe2d_tables(C, H, W, channels)   # tiny, computed once (exact cos)

    itemsize = jnp.dtype(x.dtype).itemsize
    cap_elems = max(1, max_block_bytes // itemsize)

    if H * W <= cap_elems:
        th = H
        tc = _largest_divisor(C, cap_elems // (H * W))
    else:
        tc = 1
        th = _pick_h_tile(H, max(1, cap_elems // W))

    grid = (B, C // tc, H // th)              # H innermost -> contiguous HBM writeback
    out_block_bytes = tc * th * W * itemsize
    vmem_limit = min(128 * 1024 * 1024, max(32 * 1024 * 1024, 4 * out_block_bytes))

    return pl.pallas_call(
        _pe2d_kernel,
        out_shape=jax.ShapeDtypeStruct((B, C, H, W), x.dtype),
        grid=grid,
        in_specs=[
            pl.BlockSpec((tc, th, 1), lambda b, ci, hi: (ci, hi, 0)),
            pl.BlockSpec((tc, 1, W), lambda b, ci, hi: (ci, 0, 0)),
        ],
        # Batch dim squeezed out of the kernel view; each step writes one (tc,th,W) block.
        out_specs=pl.BlockSpec((None, tc, th, W), lambda b, ci, hi: (b, ci, hi, 0)),
        compiler_params=pltpu.CompilerParams(
            dimension_semantics=("parallel", "parallel", "parallel"),
            vmem_limit_bytes=vmem_limit,
        ),
    )(tab_h, tab_w)


def _reference_pe2d(x):
    """Pure-JAX mirror of the PyTorch forward, for verification."""
    B, C, H, W = x.shape
    channels = int(math.ceil(C / 4) * 2)
    inv_freq = 1.0 / (10000.0 ** (jnp.arange(0, channels, 2, dtype=jnp.float32)
                                  / float(channels)))
    pos_x = jnp.arange(H, dtype=jnp.float32)
    pos_y = jnp.arange(W, dtype=jnp.float32)
    sin_inp_x = jnp.einsum("i,j->ij", pos_x, inv_freq)
    sin_inp_y = jnp.einsum("i,j->ij", pos_y, inv_freq)
    emb_x = jnp.concatenate([jnp.sin(sin_inp_x), jnp.cos(sin_inp_x)], -1)[:, None, :]
    emb_y = jnp.concatenate([jnp.sin(sin_inp_y), jnp.cos(sin_inp_y)], -1)
    emb = jnp.zeros((H, W, channels * 2), dtype=x.dtype)
    emb = emb.at[:, :, :channels].set(jnp.broadcast_to(emb_x, (H, W, channels)).astype(x.dtype))
    emb = emb.at[:, :, channels:2 * channels].set(
        jnp.broadcast_to(emb_y[None], (H, W, channels)).astype(x.dtype))
    out = jnp.broadcast_to(emb[None, :, :, :C], (B, H, W, C))
    return jnp.transpose(out, (0, 3, 1, 2))


if __name__ == "__main__":
    key = jax.random.PRNGKey(0)
    # Small NCHW cases: channel truncation (C < 4F), multi-group channels, bf16 output,
    # and a tiny per-block budget to exercise the H-tiling path.
    cases = [
        ((2, 4, 16, 16), jnp.float32, {}),
        ((1, 6, 8, 20), jnp.float32, {}),
        ((1, 20, 16, 16), jnp.bfloat16, {}),
        ((1, 3, 64, 128), jnp.float32, {"max_block_bytes": 16 * 1024}),
    ]
    for (shape, dtype, kw) in cases:
        key, sub = jax.random.split(key)
        # Values are never read by the module (shape/dtype only).
        x = jax.random.normal(sub, shape, dtype=jnp.float32).astype(dtype)

        out = jax.block_until_ready(positional_encoding_2d(x, **kw))
        ref = _reference_pe2d(x)

        assert out.shape == shape, (out.shape, shape)
        assert out.dtype == x.dtype, out.dtype
        assert bool(jnp.allclose(out.astype(jnp.float32), ref.astype(jnp.float32),
                                 atol=1e-5, rtol=1e-5)), f"mismatch at {shape}"

    print("KERNEL_OK")
</pallas_src>

<mosaic_0001>
module attributes {stable_mosaic.version = 11 : i64} {
  func.func @_pe2d_kernel(%arg0: i32, %arg1: i32, %arg2: i32, %arg3: memref<4x16x1xf32, #tpu.memory_space<vmem>>, %arg4: memref<4x1x16xf32, #tpu.memory_space<vmem>>, %arg5: memref<1x4x16x16xf32, #tpu.memory_space<vmem>>) attributes {dimension_semantics = [#tpu.dimension_semantics<parallel>, #tpu.dimension_semantics<parallel>, #tpu.dimension_semantics<parallel>], iteration_bounds = array<i64: 2, 1, 1>, scalar_prefetch = 0 : i64, scratch_operands = 0 : i64, tpu.core_type = #tpu.core_type<tc>, window_params = [{transform_indices = @transform_0, window_bounds = array<i64: 4, 16, 1>}, {transform_indices = @transform_1, window_bounds = array<i64: 4, 1, 16>}, {transform_indices = @transform_2, window_bounds = array<i64: 1, 4, 16, 16>}]} {
    %c0 = arith.constant 0 : index
    %c0_0 = arith.constant 0 : index
    %c0_1 = arith.constant 0 : index
    %0 = vector.load %arg3[%c0, %c0_0, %c0_1] : memref<4x16x1xf32, #tpu.memory_space<vmem>>, vector<4x16x1xf32>
    %c0_2 = arith.constant 0 : index
    %c0_3 = arith.constant 0 : index
    %c0_4 = arith.constant 0 : index
    %1 = vector.load %arg4[%c0_2, %c0_3, %c0_4] : memref<4x1x16xf32, #tpu.memory_space<vmem>>, vector<4x1x16xf32>
    %2 = vector.broadcast %0 : vector<4x16x1xf32> to vector<4x16x16xf32>
    %3 = vector.broadcast %1 : vector<4x1x16xf32> to vector<4x16x16xf32>
    %4 = arith.addf %2, %3 : vector<4x16x16xf32>
    %c0_5 = arith.constant 0 : index
    %c0_6 = arith.constant 0 : index
    %c0_7 = arith.constant 0 : index
    %c0_8 = arith.constant 0 : index
    %5 = vector.load %arg5[%c0_5, %c0_6, %c0_7, %c0_8] : memref<1x4x16x16xf32, #tpu.memory_space<vmem>>, vector<1x4x16x16xf32>
    %6 = vector.shape_cast %5 : vector<1x4x16x16xf32> to vector<4x16x16xf32>
    %7 = vector.shape_cast %4 : vector<4x16x16xf32> to vector<1x4x16x16xf32>
    tpu.vector_store %arg5[%c0_5, %c0_6, %c0_7, %c0_8], %7 {strides = array<i32>} : memref<1x4x16x16xf32, #tpu.memory_space<vmem>>, vector<1x4x16x16xf32>,
    return
  }
  func.func @transform_0(%arg0: i32, %arg1: i32, %arg2: i32) -> (i32, i32, i32) {
    %c0_i32 = arith.constant 0 : i32
    %c0_i32_0 = arith.constant 0 : i32
    return %arg1, %arg2, %c0_i32 : i32, i32, i32
  }
  func.func @transform_1(%arg0: i32, %arg1: i32, %arg2: i32) -> (i32, i32, i32) {
    %c0_i32 = arith.constant 0 : i32
    %c0_i32_0 = arith.constant 0 : i32
    %c0_i32_1 = arith.constant 0 : i32
    return %arg1, %c0_i32, %c0_i32_0 : i32, i32, i32
  }
  func.func @transform_2(%arg0: i32, %arg1: i32, %arg2: i32) -> (i32, i32, i32, i32) {
    %c0_i32 = arith.constant 0 : i32
    %c0_i32_0 = arith.constant 0 : i32
    return %arg0, %arg1, %arg2, %c0_i32 : i32, i32, i32, i32
  }
}

</mosaic_0001>

<bundles_post_ra>
// kernel: tpu_custom_call.1
= control target key start
LH: loop header
LB: loop body
LE: loop exit
PB: predicated region body
PF: predicated region fallthrough
CT: control target
= control target key end

     0   :  { %7 = vsyncpa [#allocation3], 0  ;;  %s752_s0 = inlined_call_operand.vmem [shape: f32[4,16,1], index: 0, kind: input, shape index: {}]   ;;  %s753_s1 = inlined_call_operand.vmem [shape: f32[4,1,16], index: 1, kind: input, shape index: {}]   ;;  %s754_s2 = inlined_call_operand.hbm [shape: f32[2,4,16,16], index: 2, kind: output, shape index: {}]  }
   0x1   :  { %9 = vsyncpa [#allocation3 + $0x1], 0  ;;  %s594_s9 = smov 0   ;;  %s596_s10 = smov 0  }
   0x2   :  { %s598_s11 = smov 0   ;;  %s600_s12 = smov 0  }
   0x3   :  { %s602_s13 = smov 0   ;;  %s604_s14 = smov 0  }
   0x4 LB: > { %s418_s15 = sadd.s32 4294967295, %s573_s14   ;;  %s419_s16 = sadd.s32 4294967294, %s573_s14   ;;  %s573_s14 = sphi %s604_s14, %s15_s14   ;;  %s569_s13 = sphi %s602_s13, %s761_s13   ;;  %s565_s12 = sphi %s600_s12, %s760_s12   ;;  %s561_s11 = sphi %s598_s11, %s759_s11   ;;  %s557_s10 = sphi %s596_s10, %s758_s10   ;;  %s553_s9 = sphi %s594_s9, %s757_s9  }
   0x5   : > { %s34_s17 = sadd.s32 1, %s569_s13  ;;  %s99_s18 = sadd.s32 1, %s561_s11 }
   0x6   : > { %p36_p0 = scmp.ge.s32.totalorder %s34_s17, 2  ;;  %p109_p1 = scmp.ne.s32.totalorder %s561_s11, %s557_s10 }
   0x7   : > { %p110_p2 = scmp.eq.s32.totalorder %s418_s15, 1  ;;  %p115_p3 = scmp.ne.s32.totalorder %s557_s10, %s553_s9 }
   0x8   : > { %s763_s17 = smov (%p36_p0, %s34_s17), 0  ;;  %p116_p5 = scmp.eq.s32.totalorder %s419_s16, 1 }
   0x9   : > { %p634_p4 = por %p110_p2, %p109_p1  ;;  %s92_s20 = ssub.s32 %s569_s13, %s763_s17 }
   0xa   : > { %p423_p6 = scmp.ge.s32.totalorder %s573_s14, 1  ;;  %p97_p7 = scmp.eq.s32.totalorder %s92_s20, 0 }
   0xb   : > { %p641_p8 = por %p116_p5, %p115_p3  ;;  %p157_p9 = scmp.lt.s32.totalorder %s573_s14, 3 }
   0xc   : > { %s647_s22 = scalar_select %p97_p7, %s561_s11, %s99_s18  }
   0xd   : > { %p158_p10 = pnand %p423_p6, %p157_p9 }
   0xe   : > { %v209_v0 = vld [vmem:[%s752_s0 + $0x10] sm:$0xff] (!%p158_p10)  ;;  %v207_v1 = vld [vmem:[%s752_s0] sm:$0xff] (!%p158_p10)  ;;  %v575_v2 = vmov (!%p158_p10), 0   ;;  %v210_v3 = vld [vmem:[%s752_s0 + $0x18] sm:$0xff] (!%p158_p10)  ;;  %s185_s18 = sand.u32 (!%p158_p10), 1, %s557_s10   ;;  %vm291_vm0 = vcmask (!%p158_p10), 130048  }
   0xf   : > { %161 = sbr.rel (%p158_p10) target bundleno = 173 (0xad), region = 28  ;;  %494 = vset.pattern.permute.xlu1 (!%p158_p10), %v575_v2  ;;  %493 = vset.pattern.permute.xlu0 (!%p158_p10), %v575_v2  ;;  %v208_v4 = vld [vmem:[%s752_s0 + $0x8] sm:$0xff] (!%p158_p10)  ;;  %v211_v6 = vld [vmem:[%s752_s0 + $0x20] sm:$0xff] (!%p158_p10)  ;;  %v214_v7 = vld [vmem:[%s752_s0 + $0x38] sm:$0xff] (!%p158_p10)  ;;  %s424_s20 = sshll.u32 (!%p158_p10), %s185_s18, 6 }
  0x10   : > { %231 = vperm.xlu1 (!%p158_p10), %494, %v209_v0   ;;  %221 = vperm.xlu0 (!%p158_p10), %493, %v207_v1   ;;  %v212_v5 = vld [vmem:[%s752_s0 + $0x28] sm:$0xff] (!%p158_p10)  ;;  %v213_v8 = vld [vmem:[%s752_s0 + $0x30] sm:$0xff] (!%p158_p10)  ;;  %v426_v9 = vld [vmem:[%s753_s1 + $0x1] ss:$0 sm:$0xff] (!%p158_p10)  ;;  %s187_s27 = scalar_lea.vmem (!%p158_p10), [#allocation2], %s424_s20  ;;  %s434_s30 = sshll.u32 (!%p158_p10), %s565_s12, 10 }
  0x11   : > { %v425_v10 = vld [vmem:[%s753_s1] ss:$0 sm:$0xff] (!%p158_p10)  ;;  %v427_v19 = vld [vmem:[%s753_s1 + $0x2] ss:$0 sm:$0xff] (!%p158_p10)  ;;  %s319_s3 = sshll.u32 (!%p158_p10), %s187_s27, 4  ;;  %s698_s8 = scalar_lea.hbm (!%p158_p10), %s754_s2, %s434_s30  ;;  %s700_s3 = int_to_ptr.vmem [resolvable:$true] %s319_s3 }
  0x12   : > { %v428_v24 = vld [vmem:[%s753_s1 + $0x3] ss:$0 sm:$0xff] (!%p158_p10)  ;;  %s706_s12 = scalar_lea.sflag (!%p158_p10), [#allocation3], %s185_s18  ;;  %s495_s15 = scalar_lea.vmem (!%p158_p10), %s700_s3, 1024 }
  0x13   : > { %p496_p11 = scmp.ne.s32.totalorder (!%p158_p10), %s700_s3, %s495_s15  ;;  %s576_s16 = smov (!%p158_p10), [#allocation2]  }
  0x14   : > { %236 = vperm.xlu1 (!%p158_p10), %494, %v210_v3   ;;  %226 = vperm.xlu0 (!%p158_p10), %493, %v208_v4   ;;  %s499_s20 = sshll.u32 (!%p158_p10), %s576_s16, 4  ;;  %s500_s20 = int_to_ptr.vmem [resolvable:$false] %s499_s20 }
  0x15   : > { %p497_p12 = pnand (!%p158_p10), %p496_p11, %p634_p4  ;;  %s501_s23 = scalar_lea.vmem (!%p158_p10), %s500_s20, 2048 }
  0x16   : > { %p502_p0 = scmp.lt.s32.totalorder %s700_s3, %s500_s20  ;;  %p503_p1 = scmp.lt.s32.totalorder %s501_s23, %s495_s15 }
  0x17   : > { %p498_p13 = pneg %p497_p12 }
  0x18   : > { %246 = vperm.xlu1 %494, %v212_v5   ;;  %241 = vperm.xlu0 %493, %v211_v6   ;;  %p504_p2 = por %p503_p1, %p502_p0 }
  0x1a   : > { %p505_p3 = pnand %p504_p2, %p498_p13 }
  0x1c   : > { %256 = vperm.xlu1 %494, %v214_v7   ;;  %251 = vperm.xlu0 %493, %v213_v8  }
  0x8f   : > { %v232_v11 = vpop.permute.xlu1 %231  ;;  %v222_v12 = vpop.permute.xlu0 %221 }
  0x90   : > { %v285_v13 = vadd.f32 %v426_v9, %v232_v11  ;;  %v283_v14 = vadd.f32 %v425_v10, %v222_v12 }
  0x92   : > { %294 = vst.msk [vmem:[%s187_s27 + $0x10] sm:$0xff] %vm291_vm0, %v285_v13  ;;  %292 = vst.msk [vmem:[%s187_s27] sm:$0xff] %vm291_vm0, %v283_v14 }
  0x93   : > { %v237_v15 = vpop.permute.xlu1 %236  ;;  %v227_v16 = vpop.permute.xlu0 %226 }
  0x94   : > { %v286_v17 = vadd.f32 %v426_v9, %v237_v15  ;;  %v284_v18 = vadd.f32 %v425_v10, %v227_v16 }
  0x96   : > { %295 = vst.msk [vmem:[%s187_s27 + $0x18] sm:$0xff] %vm291_vm0, %v286_v17  ;;  %293 = vst.msk [vmem:[%s187_s27 + $0x8] sm:$0xff] %vm291_vm0, %v284_v18 }
  0x97   : > { %v247_v20 = vpop.permute.xlu1 %246  ;;  %v242_v21 = vpop.permute.xlu0 %241 }
  0x98   : > { %v288_v22 = vadd.f32 %v427_v19, %v247_v20  ;;  %v287_v23 = vadd.f32 %v427_v19, %v242_v21 }
  0x9a   : > { %297 = vst.msk [vmem:[%s187_s27 + $0x28] sm:$0xff] %vm291_vm0, %v288_v22  ;;  %296 = vst.msk [vmem:[%s187_s27 + $0x20] sm:$0xff] %vm291_vm0, %v287_v23 }
  0x9b   : > { %v257_v25 = vpop.permute.xlu1 %256  ;;  %v252_v26 = vpop.permute.xlu0 %251 }
  0x9c   : > { %v290_v27 = vadd.f32 %v428_v24, %v257_v25  ;;  %v289_v28 = vadd.f32 %v428_v24, %v252_v26 }
  0x9e   : > { %299 = vst.msk [vmem:[%s187_s27 + $0x38] sm:$0xff] %vm291_vm0, %v290_v27  ;;  %298 = vst.msk [vmem:[%s187_s27 + $0x30] sm:$0xff] %vm291_vm0, %v289_v28 }
  0x9f   : > { %508 = shalt.err (!%p505_p3)
}
  0xa0   : > { %s509_s18 = scalar_lea.hbm %s698_s8, 1024  ;;  %s513_s26 = scalar_lea.hbm %s754_s2, 2048 }
  0xa1   : > { %p510_p5 = scmp.ne.s32.totalorder %s698_s8, %s509_s18  ;;  %p514_p9 = scmp.lt.u32.totalorder %s698_s8, %s754_s2 }
  0xa2   : > { %p515_p10 = scmp.lt.u32.totalorder %s513_s26, %s509_s18  ;;  %p517_p12 = scmp.lt.u32.totalorder %s509_s18, %s698_s8 }
  0xa3   : > { %p511_p6 = pnand %p510_p5, %p634_p4 }
  0xa4   : > { %p516_p11 = por %p515_p10, %p514_p9 }
  0xa5   : > { %p512_p7 = pneg %p511_p6 }
  0xa6   : > { %p518_p13 = por %p517_p12, %p516_p11 }
  0xa8   : > { %p519_p0 = pnand %p518_p13, %p512_p7 }
  0xaa   : > { %522 = shalt.err (!%p519_p0)
}
  0xab   : > { %s577_s29 = smov 128   ;;  %s578_s30 = smov 8  }
  0xac   : > { %435 = dma.vmem_to_hbm [thread:$0]  (%p634_p4), %s700_s3, 1024, %s698_s8, %s706_s12, %s577_s29, %s577_s29, %s578_s30  }
  0xad PF: > { %p441_p1 = scmp.ge.s32.totalorder %s573_s14, 2  ;;  %s334_s4 = sand.u32 1, %s553_s9  }
  0xae   : > { %s335_s5 = scalar_lea.sflag [#allocation3], %s334_s4 }
  0xaf   : > { %p438_p2 = pnand %p441_p1, %p641_p8 }
  0xb1   : > { %548 = dma.done.wait (!%p438_p2), %s335_s5, 1024  }
  0xb2   : > { %550 = vsyncadd (!%p438_p2), %s335_s5, 4294966272  ;;  %s15_s14 = sadd.s32 1, %s573_s14   ;;  %s757_s9 = smov %s557_s10 }
  0xb3   : > { %p12_p3 = scmp.ge.s32.totalorder %s15_s14, 4   ;;  %s758_s10 = smov %s561_s11 }
  0xb4   : > { %s759_s11 = smov %s647_s22  ;;  %s760_s12 = smov %s569_s13 }
  0xb5   : > { %s761_s13 = smov %s763_s17  ;;  %14 = sbr.rel (!%p12_p3) target bundleno = 4 (0x4), region = 66 }
  0xbc   :  { %340 = vsyncpa [#allocation3], 1 }
  0xbd   :  { %342 = vsyncpa [#allocation3 + $0x1], 1 }

</bundles_post_ra>
